<compile_context>
chip_gen: v7x
topology: tpu7x:2x2x1
jax: 0.10.0
libtpu: 0.0.40
codegen_flags: <defaults>
</compile_context>

<pallas_src>
import jax
import jax.numpy as jnp
from jax.experimental import pallas as pl
from jax.experimental.pallas import tpu as pltpu
from functools import partial


_TILE_PREF = 512  # default max tile edge; ~7 MiB working set, safe on all gens


def _round_up(a, b):
    return (a + b - 1) // b * b


def _pick_tile(padded, pref=_TILE_PREF):
    """`padded` is a multiple of 128. Return a clean tile that divides it."""
    if padded <= pref:
        return padded
    for t in (pref, 256, 128):
        if padded % t == 0:
            return t
    return 128


def _vmem_limit_bytes(working_set_bytes):
    try:
        info = pltpu.get_tpu_info()
        cap = int(getattr(info, "vmem_capacity_bytes", 0)) or 64 * 1024 * 1024
    except Exception:
        cap = 64 * 1024 * 1024  # v7x per-TC size: safe lower bound for all gens
    limit = max(32 * 1024 * 1024, 2 * int(working_set_bytes))
    return int(min(limit, cap * 3 // 4))


# ----------------------------- kernels ---------------------------------------


def _equal_linear_small_kernel(x_ref, w_ref, b_ref, o_ref, *, lr_mul):
    """Whole problem in one block: matmul + bias + lr_mul epilogue."""
    acc = jnp.dot(x_ref[...], w_ref[...], preferred_element_type=jnp.float32)
    o_ref[...] = ((acc + b_ref[...]) * lr_mul).astype(o_ref.dtype)


def _equal_linear_kernel_f32out(x_ref, w_ref, b_ref, o_ref, *, lr_mul):
    """Tiled path, float32 output: accumulate directly into the resident o_ref."""
    k = pl.program_id(2)

    @pl.when(k == 0)
    def _init():
        o_ref[...] = jnp.zeros_like(o_ref)

    o_ref[...] += jnp.dot(x_ref[...], w_ref[...], preferred_element_type=jnp.float32)

    @pl.when(k == pl.num_programs(2) - 1)
    def _finalize():
        o_ref[...] = (o_ref[...] + b_ref[...]) * lr_mul


def _equal_linear_kernel_acc(x_ref, w_ref, b_ref, o_ref, acc_ref, *, lr_mul):
    """Tiled path, narrow output dtype: f32 VMEM accumulator + cast epilogue."""
    k = pl.program_id(2)

    @pl.when(k == 0)
    def _init():
        acc_ref[...] = jnp.zeros_like(acc_ref)

    acc_ref[...] += jnp.dot(x_ref[...], w_ref[...], preferred_element_type=jnp.float32)

    @pl.when(k == pl.num_programs(2) - 1)
    def _finalize():
        o_ref[...] = ((acc_ref[...] + b_ref[...]) * lr_mul).astype(o_ref.dtype)


# ----------------------------- wrapper ---------------------------------------


def prepare_equal_linear_params(weight, bias=None, *, mxu_dtype=None):
    """One-time parameter relayout (hoisted out of the per-call path).

    weight: (out_dim, in_dim) -> transposed + zero-padded (Kp, Np), Kp/Np % 128 == 0
    bias:   (out_dim,) or None -> float32 (1, Np)
    """
    N, K = weight.shape
    Kp = _round_up(K, 128)
    Np = _round_up(N, 128)
    w = weight.astype(mxu_dtype) if mxu_dtype is not None else weight
    w_kn = jnp.pad(w.T, ((0, Kp - K), (0, Np - N)))
    b = jnp.zeros((N,), dtype=jnp.float32) if bias is None else bias.astype(jnp.float32)
    b_pn = jnp.pad(b.reshape(1, N), ((0, 0), (0, Np - N)))
    return {"w_kn": w_kn, "b_pn": b_pn}


def equal_linear_apply(params, x, *, out_dim, lr_mul=1.0, mxu_dtype=None,
                       tile_pref=_TILE_PREF):
    """x: (batch, in_dim). Returns (batch, out_dim) in x's original dtype."""
    w_kn = params["w_kn"]
    b_pn = params["b_pn"]
    Kp, Np = w_kn.shape
    M, K = x.shape
    N = out_dim
    out_dtype = x.dtype
    lr_mul = float(lr_mul)

    if mxu_dtype is not None:
        x = x.astype(mxu_dtype)
        if w_kn.dtype != jnp.dtype(mxu_dtype):
            w_kn = w_kn.astype(mxu_dtype)

    # ---------- tiny-shape fast path: single invocation, no K loop ----------
    Mp = _round_up(M, 8)
    if Mp <= tile_pref and Kp <= tile_pref and Np <= tile_pref:
        x_p = jnp.pad(x, ((0, Mp - M), (0, Kp - K)))
        out_p = pl.pallas_call(
            partial(_equal_linear_small_kernel, lr_mul=lr_mul),
            out_shape=jax.ShapeDtypeStruct((Mp, Np), out_dtype),
            in_specs=[
                pl.BlockSpec(memory_space=pltpu.MemorySpace.VMEM),
                pl.BlockSpec(memory_space=pltpu.MemorySpace.VMEM),
                pl.BlockSpec(memory_space=pltpu.MemorySpace.VMEM),
            ],
            out_specs=pl.BlockSpec(memory_space=pltpu.MemorySpace.VMEM),
        )(x_p, w_kn, b_pn)
        return out_p[:M, :N]

    # ------------------------- general tiled path ---------------------------
    tn = _pick_tile(Np, tile_pref)
    tk = _pick_tile(Kp, tile_pref)
    if Mp > tile_pref:
        Mp = _round_up(M, 128)
        tm = _pick_tile(Mp, tile_pref)
    else:
        tm = Mp

    x_p = jnp.pad(x, ((0, Mp - M), (0, Kp - K)))
    grid = (Mp // tm, Np // tn, Kp // tk)

    use_f32_out = jnp.dtype(out_dtype) == jnp.dtype(jnp.float32)
    kernel = (partial(_equal_linear_kernel_f32out, lr_mul=lr_mul) if use_f32_out
              else partial(_equal_linear_kernel_acc, lr_mul=lr_mul))
    scratch = [] if use_f32_out else [pltpu.VMEM((tm, tn), jnp.float32)]

    x_b = jnp.dtype(x_p.dtype).itemsize
    w_b = jnp.dtype(w_kn.dtype).itemsize
    working = 2 * (tm * tk * x_b + tk * tn * w_b + tn * 4) + tm * tn * 4
    if not use_f32_out:
        working += tm * tn * (4 + jnp.dtype(out_dtype).itemsize)

    out_p = pl.pallas_call(
        kernel,
        out_shape=jax.ShapeDtypeStruct((Mp, Np), out_dtype),
        grid_spec=pltpu.PrefetchScalarGridSpec(
            num_scalar_prefetch=0,
            grid=grid,
            in_specs=[
                pl.BlockSpec((tm, tk), lambda i, j, k: (i, k)),   # activations
                pl.BlockSpec((tk, tn), lambda i, j, k: (k, j)),   # weight (K, N)
                pl.BlockSpec((1, tn), lambda i, j, k: (0, j)),    # bias (1, N)
            ],
            out_specs=pl.BlockSpec((tm, tn), lambda i, j, k: (i, j)),
            scratch_shapes=scratch,
        ),
        compiler_params=pltpu.CompilerParams(
            dimension_semantics=("parallel", "parallel", "arbitrary"),
            vmem_limit_bytes=_vmem_limit_bytes(working),
        ),
    )(x_p, w_kn, b_pn)

    return out_p[:M, :N]


# ------------------------------- demo ----------------------------------------

if __name__ == "__main__":
    key = jax.random.PRNGKey(0)
    k_x, k_w, k_x2, k_w2, k_b2 = jax.random.split(key, 5)

    apply_fn = jax.jit(
        equal_linear_apply,
        static_argnames=("out_dim", "lr_mul", "mxu_dtype", "tile_pref"),
    )

    # -- Case 1: module-sized shapes: EqualLinear(32, 64, lr_mul=0.5), batch=8 --
    in_dim, out_dim, batch, lr_mul = 32, 64, 8, 0.5
    weight = jax.random.normal(k_w, (out_dim, in_dim), dtype=jnp.float32)
    bias = jnp.zeros((out_dim,), dtype=jnp.float32)   # torch.zeros init
    x = jax.random.normal(k_x, (batch, in_dim), dtype=jnp.float32)

    params = prepare_equal_linear_params(weight, bias)   # one-time relayout
    out = jax.block_until_ready(apply_fn(params, x, out_dim=out_dim, lr_mul=lr_mul))
    ref = (jnp.dot(x, (weight * lr_mul).T, precision=jax.lax.Precision.HIGHEST)
           + bias * lr_mul)
    assert out.shape == (batch, out_dim)
    assert jnp.allclose(out, ref, atol=1e-5, rtol=1e-5), "fast-path mismatch"

    # -- Case 2: shapes exercising the tiled (M, N, K)-grid path --
    M2, K2, N2 = 640, 640, 768
    weight2 = jax.random.normal(k_w2, (N2, K2), dtype=jnp.float32)
    bias2 = jax.random.normal(k_b2, (N2,), dtype=jnp.float32)
    x2 = jax.random.normal(k_x2, (M2, K2), dtype=jnp.float32)

    params2 = prepare_equal_linear_params(weight2, bias2)
    out2 = jax.block_until_ready(apply_fn(params2, x2, out_dim=N2, lr_mul=lr_mul))
    ref2 = (jnp.dot(x2, (weight2 * lr_mul).T, precision=jax.lax.Precision.HIGHEST)
            + bias2 * lr_mul)
    assert out2.shape == (M2, N2)
    assert jnp.allclose(out2, ref2, atol=1e-2, rtol=1e-3), "tiled-path mismatch"

    # -- Case 3: optional bf16 MXU-operand mode (f32 accumulate + epilogue) --
    params2_bf16 = prepare_equal_linear_params(weight2, bias2, mxu_dtype=jnp.bfloat16)
    out2_bf16 = jax.block_until_ready(
        apply_fn(params2_bf16, x2, out_dim=N2, lr_mul=lr_mul, mxu_dtype=jnp.bfloat16))
    assert jnp.allclose(out2_bf16, ref2, atol=0.5, rtol=5e-2), "bf16 mode mismatch"

    print("KERNEL_OK")
</pallas_src>

<mosaic_0001>
module attributes {stable_mosaic.version = 11 : i64} {
  func.func @_equal_linear_small_kernel(%arg0: memref<8x128xf32, #tpu.memory_space<vmem>>, %arg1: memref<128x128xf32, #tpu.memory_space<vmem>>, %arg2: memref<1x128xf32, #tpu.memory_space<vmem>>, %arg3: memref<8x128xf32, #tpu.memory_space<vmem>>) attributes {dimension_semantics = [], scalar_prefetch = 0 : i64, scratch_operands = 0 : i64, tpu.core_type = #tpu.core_type<tc>} {
    %c0 = arith.constant 0 : index
    %c0_0 = arith.constant 0 : index
    %0 = vector.load %arg0[%c0, %c0_0] : memref<8x128xf32, #tpu.memory_space<vmem>>, vector<8x128xf32>
    %c0_1 = arith.constant 0 : index
    %c0_2 = arith.constant 0 : index
    %1 = vector.load %arg1[%c0_1, %c0_2] : memref<128x128xf32, #tpu.memory_space<vmem>>, vector<128x128xf32>
    %cst = arith.constant dense<0.000000e+00> : vector<8x128xf32>
    %2 = tpu.matmul %0, %1, %cst {dimension_numbers = #tpu.dot_dimension_numbers<[1], [0], [0], [1], [0, 0, 1, 1], [], []>} : vector<8x128xf32>, vector<128x128xf32>, vector<8x128xf32> -> vector<8x128xf32>
    %c0_3 = arith.constant 0 : index
    %c0_4 = arith.constant 0 : index
    %3 = vector.load %arg2[%c0_3, %c0_4] : memref<1x128xf32, #tpu.memory_space<vmem>>, vector<1x128xf32>
    %4 = vector.broadcast %3 : vector<1x128xf32> to vector<8x128xf32>
    %5 = arith.addf %2, %4 : vector<8x128xf32>
    %cst_5 = arith.constant 5.000000e-01 : f32
    %6 = vector.broadcast %cst_5 : f32 to vector<8x128xf32>
    %7 = arith.mulf %5, %6 : vector<8x128xf32>
    %c0_6 = arith.constant 0 : index
    %c0_7 = arith.constant 0 : index
    %8 = vector.load %arg3[%c0_6, %c0_7] : memref<8x128xf32, #tpu.memory_space<vmem>>, vector<8x128xf32>
    tpu.vector_store %arg3[%c0_6, %c0_7], %7 {strides = array<i32>} : memref<8x128xf32, #tpu.memory_space<vmem>>, vector<8x128xf32>,
    return
  }
}

</mosaic_0001>

<bundles_post_ra>
// kernel: equal_linear_apply.1
= control target key start
LH: loop header
LB: loop body
LE: loop exit
PB: predicated region body
PF: predicated region fallthrough
CT: control target
= control target key end

     0   :  { %8 = vsyncpa [#allocation3], 0  ;;  %s329_s0 = inlined_call_operand.vmem [shape: f32[8,128], index: 0, kind: input, shape index: {}]   ;;  %s330_s1 = inlined_call_operand.hbm [shape: f32[128,128], index: 1, kind: input, shape index: {}]   ;;  %s331_s2 = inlined_call_operand.vmem [shape: f32[1,128], index: 2, kind: input, shape index: {}]   ;;  %s332_s3 = inlined_call_operand.hbm [shape: f32[8,128], index: 3, kind: output, shape index: {}]  }
   0x1   :  { %9 = vsyncpa [#allocation4], 0  ;;  %s272_s12 = smov [#allocation2]   ;;  %s224_s16 = scalar_lea.hbm %s330_s1, 2048 }
   0x2   :  { %s17_s13 = sshll.u32 %s272_s12, 4  ;;  %p225_p0 = scmp.ne.s32.totalorder %s330_s1, %s224_s16  ;;  %s18_s13 = int_to_ptr.vmem [resolvable:$true] %s17_s13 }
   0x3   :  { %p228_p1 = scmp.lt.u32.totalorder %s224_s16, %s330_s1 }
   0x5   :  { %p230_p2 = pnand %p228_p1, %p225_p0 }
   0x7   :  { %233 = shalt.err (!%p230_p2)
}
   0x8   :  { %s234_s21 = scalar_lea.vmem %s18_s13, 2048  ;;  %p239_p4 = scmp.lt.s32.totalorder %s18_s13, %s18_s13 }
   0x9   :  { %p235_p3 = scmp.ne.s32.totalorder %s18_s13, %s234_s21  ;;  %p240_p5 = scmp.lt.s32.totalorder %s234_s21, %s234_s21 }
   0xb   :  { %p241_p6 = por %p240_p5, %p239_p4 }
   0xd   :  { %p242_p7 = pnand %p241_p6, %p235_p3 }
   0xf   :  { %245 = shalt.err (!%p242_p7)
}
  0x10   :  { %s273_s22 = smov 128   ;;  %s274_s23 = smov 8  }
  0x11   :  { %23 = dma.hbm_to_vmem [thread:$0]  %s330_s1, 2048, %s18_s13, [#allocation3], %s273_s22, %s273_s22, %s274_s23  }
  0x12   :  { %268 = dma.done.wait [#allocation3], 2048  }
  0x13   :  { %269 = vsyncadd [#allocation3], 4294965248  ;;  %v275_v0 = vmov 0.0|0.0   ;;  %vm276_vm0 = vmmov 0   ;;  %v277_v1 = vmov 0.0   ;;  %v30_v2 = vld [vmem:[#allocation2] sm:$0xff] }
  0x14   :  { %193 = vmatprep.subr.bf16.mxu0 %v275_v0  ;;  %190 = vmatprep.mubr.msk.f32.mxu0 %vm276_vm0, %v277_v1  ;;  %v31_v3 = vld [vmem:[#allocation2 + $0x8] sm:$0xff]  ;;  %v32_v4 = vld [vmem:[#allocation2 + $0x10] sm:$0xff]  ;;  %v33_v6 = vld [vmem:[#allocation2 + $0x18] sm:$0xff]  ;;  %s278_s29 = smov [#allocation5]  }
  0x15   :  { %v194_v5 = vpack.c.bf16 %v31_v3, %v30_v2  ;;  %v197_v7 = vpack.c.bf16 %v33_v6, %v32_v4  ;;  %v34_v8 = vld [vmem:[#allocation2 + $0x20] sm:$0xff]  ;;  %v35_v9 = vld [vmem:[#allocation2 + $0x28] sm:$0xff]  ;;  %v36_v11 = vld [vmem:[#allocation2 + $0x30] sm:$0xff]  ;;  %s131_s30 = sshll.u32 %s278_s29, 4  ;;  %s132_s30 = int_to_ptr.vmem [resolvable:$true] %s131_s30 }
  0x16   :  { %v200_v10 = vpack.c.bf16 %v35_v9, %v34_v8  ;;  %v37_v12 = vld [vmem:[#allocation2 + $0x38] sm:$0xff]  ;;  %v38_v14 = vld [vmem:[#allocation2 + $0x40] sm:$0xff]  ;;  %v39_v15 = vld [vmem:[#allocation2 + $0x48] sm:$0xff]  ;;  %s246_s4 = scalar_lea.vmem %s132_s30, 128  ;;  %p251_p9 = scmp.lt.s32.totalorder %s132_s30, %s132_s30 }
  0x17   :  { %195 = vmatpush3.bf16.msra.mxu0 %v194_v5  ;;  %v203_v13 = vpack.c.bf16 %v37_v12, %v36_v11  ;;  %v206_v16 = vpack.c.bf16 %v39_v15, %v38_v14  ;;  %v40_v17 = vld [vmem:[#allocation2 + $0x50] sm:$0xff]  ;;  %v41_v18 = vld [vmem:[#allocation2 + $0x58] sm:$0xff]  ;;  %v42_v20 = vld [vmem:[#allocation2 + $0x60] sm:$0xff]  ;;  %p247_p8 = scmp.ne.s32.totalorder %s132_s30, %s246_s4  ;;  %p252_p10 = scmp.lt.s32.totalorder %s246_s4, %s246_s4 }
  0x18   :  { %196 = vmatprep.subr.bf16.mxu0 %v275_v0  ;;  %v209_v19 = vpack.c.bf16 %v41_v18, %v40_v17  ;;  %v43_v21 = vld [vmem:[#allocation2 + $0x68] sm:$0xff]  ;;  %v44_v23 = vld [vmem:[#allocation2 + $0x70] sm:$0xff]  ;;  %v45_v24 = vld [vmem:[#allocation2 + $0x78] sm:$0xff] }
  0x19   :  { %v212_v22 = vpack.c.bf16 %v43_v21, %v42_v20  ;;  %v215_v25 = vpack.c.bf16 %v45_v24, %v44_v23  ;;  %v29_v26 = vld [vmem:[%s329_s0] sm:$0xff]  ;;  %p253_p11 = por %p252_p10, %p251_p9 }
  0x1a   :  { %v140_v27 = vld [vmem:[%s331_s2] ss:$0 sm:$0xff] }
  0x1b   :  { %198 = vmatpush3.bf16.msra.mxu0 %v197_v7  ;;  %p254_p12 = pnand %p253_p11, %p247_p8 }
  0x1c   :  { %199 = vmatprep.subr.bf16.mxu0 %v275_v0 }
  0x1f   :  { %201 = vmatpush3.bf16.msra.mxu0 %v200_v10 }
  0x20   :  { %202 = vmatprep.subr.bf16.mxu0 %v275_v0 }
  0x23   :  { %204 = vmatpush3.bf16.msra.mxu0 %v203_v13 }
  0x24   :  { %205 = vmatprep.subr.bf16.mxu0 %v275_v0 }
  0x27   :  { %207 = vmatpush3.bf16.msra.mxu0 %v206_v16 }
  0x28   :  { %208 = vmatprep.subr.bf16.mxu0 %v275_v0 }
  0x2b   :  { %210 = vmatpush3.bf16.msra.mxu0 %v209_v19 }
  0x2c   :  { %211 = vmatprep.subr.bf16.mxu0 %v275_v0 }
  0x2f   :  { %213 = vmatpush3.bf16.msra.mxu0 %v212_v22 }
  0x30   :  { %214 = vmatprep.subr.bf16.mxu0 %v275_v0 }
  0x33   :  { %216 = vmatpush3.bf16.msra.mxu0 %v215_v25 }
  0x36   :  { %191 = vmatmul.mubr.f32.vlgmr.msra.gmra.mrb[0].mxu0 %v29_v26 }
 0x109   :  { %v119_v28 = vpop.f32.mrb[0].mxu0 }
 0x10a   :  { %v120_v29 = vadd.f32 %v140_v27, %v119_v28  ;;  %v192_v30 = vpop.f32.mrb[1].mxu0 }
 0x10c   :  { %v123_v31 = vmul.f32 0.5, %v120_v29 }
 0x10e   :  { %124 = vst [vmem:[#allocation5] sm:$0xff] %v123_v31 }
 0x10f   :  { %257 = shalt.err (!%p254_p12)
}
 0x110   :  { %s258_s6 = scalar_lea.hbm %s332_s3, 128 }
 0x111   :  { %p259_p13 = scmp.ne.s32.totalorder %s332_s3, %s258_s6  ;;  %p262_p0 = scmp.lt.u32.totalorder %s258_s6, %s332_s3 }
 0x113   :  { %p264_p1 = pnand %p262_p0, %p259_p13 }
 0x115   :  { %267 = shalt.err (!%p264_p1)
}
 0x116   :  { %134 = dma.vmem_to_hbm [thread:$0]  %s132_s30, 128, %s332_s3, [#allocation4]  }
 0x117   :  { %270 = dma.done.wait [#allocation4], 128  }
 0x118   :  { %271 = vsyncadd [#allocation4], 4294967168 }
 0x119   :  { %138 = vsyncpa [#allocation3], 1 }
 0x11a   :  { %139 = vsyncpa [#allocation4], 1 }

</bundles_post_ra>
